<compile_context>
chip_gen: v6e
topology: v6e:2x2x1
jax: 0.10.0
libtpu: 0.0.40
codegen_flags: <defaults>
</compile_context>

<pallas_src>
import jax
import jax.numpy as jnp
from jax.experimental import pallas as pl
from jax.experimental.pallas import tpu as pltpu

_NUM_DMA_CHUNKS = 8                 # independent DMAs in flight (hides per-DMA setup)
_MIN_BYTES_TO_CHUNK = 1 << 20       # below ~1 MiB a single whole-array DMA is best


def _chunk_bounds(shape, itemsize):
    """Static (row_start, row_count) chunks along the leading axis."""
    d0 = shape[0]
    total_bytes = itemsize
    for d in shape:
        total_bytes *= d
    if total_bytes < _MIN_BYTES_TO_CHUNK or d0 <= 1:
        return [(0, d0)]
    n_chunks = min(_NUM_DMA_CHUNKS, d0)
    rows_per = -(-d0 // n_chunks)   # ceil
    chunks = []
    start = 0
    while start < d0:
        size = min(rows_per, d0 - start)
        chunks.append((start, size))
        start += size
    return chunks


def _make_dma_copy_kernel(chunks):
    """Kernel: HBM->HBM copy of `chunks` (start all DMAs, then wait all)."""

    def kernel(x_hbm, o_hbm, sems):
        copies = []
        for i, (start, size) in enumerate(chunks):
            cp = pltpu.make_async_copy(
                x_hbm.at[pl.ds(start, size)],
                o_hbm.at[pl.ds(start, size)],
                sems.at[i],
            )
            cp.start()
            copies.append(cp)
        for cp in copies:
            cp.wait()

    return kernel


def identity(x: jax.Array, *, materialize: bool = True) -> jax.Array:
    """Identity forward pass.

    materialize=False  -> return x (zero-cost; the real optimum for Identity).
    materialize=True   -> bit-exact independent copy via HBM->HBM DMA in Pallas.
    """
    if not materialize:
        return x
    if x.size == 0:
        return x

    orig_shape = x.shape
    work = x if x.ndim >= 1 else x.reshape(1)   # 0-d scalars: copy as (1,)
    chunks = _chunk_bounds(work.shape, work.dtype.itemsize)
    kernel = _make_dma_copy_kernel(chunks)

    out = pl.pallas_call(
        kernel,
        out_shape=jax.ShapeDtypeStruct(work.shape, work.dtype),
        in_specs=[pl.BlockSpec(memory_space=pl.ANY)],
        out_specs=pl.BlockSpec(memory_space=pl.ANY),
        scratch_shapes=[pltpu.SemaphoreType.DMA((len(chunks),))],
    )(work)

    return out.reshape(orig_shape)


if __name__ == "__main__":
    key = jax.random.PRNGKey(0)
    x = jax.random.normal(key, (2, 4, 16, 16), dtype=jnp.float32)

    # Materialized Pallas copy path (exercises the kernel).
    y = identity(x)
    jax.block_until_ready(y)

    assert y.shape == x.shape and y.dtype == x.dtype
    assert bool(jnp.all(y == x))

    # Zero-copy fast path (the actual optimum for Identity).
    y_fast = identity(x, materialize=False)
    assert y_fast is x

    print("KERNEL_OK")
</pallas_src>

<mosaic_0001>
module attributes {stable_mosaic.version = 11 : i64} {
  func.func @kernel(%arg0: memref<2x4x16x16xf32, #tpu.memory_space<any>>, %arg1: memref<2x4x16x16xf32, #tpu.memory_space<any>>, %arg2: memref<1x!tpu.dma_semaphore, #tpu.memory_space<semaphore_mem>>) attributes {dimension_semantics = [], scalar_prefetch = 0 : i64, scratch_operands = 1 : i64, tpu.core_type = #tpu.core_type<tc>} {
    %c0_i32 = arith.constant 0 : i32
    %c0_i32_0 = arith.constant 0 : i32
    %c0_i32_1 = arith.constant 0 : i32
    %c0_i32_2 = arith.constant 0 : i32
    %c0_i32_3 = arith.constant 0 : i32
    %0 = tpu.memref_slice %arg0[%c0_i32_0, %c0_i32_1, %c0_i32_2, %c0_i32_3] : memref<2x4x16x16xf32, #tpu.memory_space<any>> -> memref<2x4x16x16xf32, #tpu.memory_space<any>>
    %c0_i32_4 = arith.constant 0 : i32
    %c0_i32_5 = arith.constant 0 : i32
    %c0_i32_6 = arith.constant 0 : i32
    %c0_i32_7 = arith.constant 0 : i32
    %1 = tpu.memref_slice %arg1[%c0_i32_4, %c0_i32_5, %c0_i32_6, %c0_i32_7] : memref<2x4x16x16xf32, #tpu.memory_space<any>> -> memref<2x4x16x16xf32, #tpu.memory_space<any>>
    %2 = tpu.memref_slice %arg2[%c0_i32] : memref<1x!tpu.dma_semaphore, #tpu.memory_space<semaphore_mem>> -> memref<1x!tpu.dma_semaphore, #tpu.memory_space<semaphore_mem>>
    %3 = tpu.memref_squeeze %2 : memref<1x!tpu.dma_semaphore, #tpu.memory_space<semaphore_mem>> -> memref<!tpu.dma_semaphore, #tpu.memory_space<semaphore_mem>>
    tpu.enqueue_dma source(%0 : memref<2x4x16x16xf32, #tpu.memory_space<any>>) target(%1 : memref<2x4x16x16xf32, #tpu.memory_space<any>>) target_semaphore(%3 : memref<!tpu.dma_semaphore, #tpu.memory_space<semaphore_mem>>)
    %c0_i32_8 = arith.constant 0 : i32
    %c0_i32_9 = arith.constant 0 : i32
    %c0_i32_10 = arith.constant 0 : i32
    %c0_i32_11 = arith.constant 0 : i32
    %c0_i32_12 = arith.constant 0 : i32
    %4 = tpu.memref_slice %arg0[%c0_i32_9, %c0_i32_10, %c0_i32_11, %c0_i32_12] : memref<2x4x16x16xf32, #tpu.memory_space<any>> -> memref<2x4x16x16xf32, #tpu.memory_space<any>>
    %c0_i32_13 = arith.constant 0 : i32
    %c0_i32_14 = arith.constant 0 : i32
    %c0_i32_15 = arith.constant 0 : i32
    %c0_i32_16 = arith.constant 0 : i32
    %5 = tpu.memref_slice %arg1[%c0_i32_13, %c0_i32_14, %c0_i32_15, %c0_i32_16] : memref<2x4x16x16xf32, #tpu.memory_space<any>> -> memref<2x4x16x16xf32, #tpu.memory_space<any>>
    %6 = tpu.memref_slice %arg2[%c0_i32_8] : memref<1x!tpu.dma_semaphore, #tpu.memory_space<semaphore_mem>> -> memref<1x!tpu.dma_semaphore, #tpu.memory_space<semaphore_mem>>
    %7 = tpu.memref_squeeze %6 : memref<1x!tpu.dma_semaphore, #tpu.memory_space<semaphore_mem>> -> memref<!tpu.dma_semaphore, #tpu.memory_space<semaphore_mem>>
    tpu.wait_dma2 semaphore(%7 : memref<!tpu.dma_semaphore, #tpu.memory_space<semaphore_mem>>) src(%4 : memref<2x4x16x16xf32, #tpu.memory_space<any>>) dst(%5 : memref<2x4x16x16xf32, #tpu.memory_space<any>>)
    return
  }
}

</mosaic_0001>

<bundles_post_ra>
// kernel: tpu_custom_call.1
= control target key start
LH: loop header
LB: loop body
LE: loop exit
PB: predicated region body
PF: predicated region fallthrough
CT: control target
= control target key end

     0   :  { %s30_s6 = smov [#allocation2]   ;;  %s31_s7 = smov 131072   ;;  %s49_s0 = inlined_call_operand.hbm [shape: f32[2,4,16,16], index: 0, kind: input, shape index: {}]   ;;  %s50_s1 = inlined_call_operand.hbm [shape: f32[2,4,16,16], index: 1, kind: output, shape index: {}]  }
   0x1   :  { %s32_s8 = smov 0  }
   0x2   :  { %12 = dma.general %s49_s0, 2048, %s50_s1, %s30_s6, %s31_s7, [#allocation4], %s32_s8, 0  }
   0x3   :  { %28 = dma.done.wait [#allocation2], 2048 }
   0x4   :  { %29 = vsyncadd [#allocation2], 4294965248 }
   0x5   :  { %18 = vsyncmov [#allocation2] }
   0x8   :  { %s19_s13 = vpop.sfrf %18 }
   0x9   :  { %p24_p0 = scmp.ne.s32.totalorder %s19_s13, 0 }
   0xb   :  { %23 = shalt.err (%p24_p0)  }

</bundles_post_ra>
